<compile_context>
chip_gen: v7x
topology: tpu7x:2x2x1
jax: 0.10.0
libtpu: 0.0.40
codegen_flags: <defaults>
</compile_context>

<pallas_src>
import jax
import jax.numpy as jnp
from jax.experimental import pallas as pl
from jax.experimental.pallas import tpu as pltpu


def _patch_embed_kernel(p_ref, w_ref, b_ref, o_ref):
    # p_ref: (TMf, Kf) folded patch rows; w_ref: (Kf, N) (block-diag) weight;
    # b_ref: (1, N) tiled bias; o_ref: (TMf, N) lane-dense output tile.
    acc = jnp.dot(p_ref[...], w_ref[...], preferred_element_type=jnp.float32)
    o_ref[...] = (acc + b_ref[...]).astype(o_ref.dtype)


def patch_embed_1d(x, weight, bias, patch_size, *, tile_rows=8192,
                   use_bf16=False, input_layout="BCL"):
    """
    x:      (B, C, L) if input_layout == "BCL" (PyTorch Conv1d layout)
            (B, L, C) if input_layout == "BLC" (patchify is a free reshape)
    weight: (E, C, patch_size)   float32 (PyTorch Conv1d weight layout)
    bias:   (E,)
    returns (B, L // patch_size, E) in x.dtype  (matches PyTorch forward)
    """
    E, C_w, P = weight.shape
    assert P == patch_size
    if input_layout == "BCL":
        B, C, L = x.shape
    else:
        B, L, C = x.shape
    assert C == C_w
    assert L % patch_size == 0, "traj_length must be divisible by patch_size"
    L_out = L // patch_size
    M = B * L_out
    K = C * patch_size

    # ---- patchify + flatten weight -----------------------------------------
    if input_layout == "BCL":
        # (B, C, L) -> (B, C, L_out, P) -> (B, L_out, C, P) -> (M, C*P)
        # This transpose is the only remaining extra HBM pass; it touches M*K
        # input elements only (K << E for realistic embed_dim).
        patches = jnp.transpose(x.reshape(B, C, L_out, patch_size),
                                (0, 2, 1, 3)).reshape(M, K)
        w_flat = weight.reshape(E, K).T                           # (K, E), (c,p) order
    else:  # "BLC": pure reshape, no transpose pass
        patches = x.reshape(M, K)                                 # (p,c) order
        w_flat = jnp.transpose(weight, (2, 1, 0)).reshape(K, E)   # (p,c) order

    if use_bf16:
        patches = patches.astype(jnp.bfloat16)
        w_flat = w_flat.astype(jnp.bfloat16)

    # ---- lane-dense output folding ------------------------------------------
    if E % 128 == 0:
        R = 1                      # already lane-dense
    elif 128 % E == 0:
        R = 128 // E
    else:
        R = 1                      # fallback: accept masked partial stores
    N = R * E                      # kernel output lane width
    Kf = R * K                     # folded contraction width

    # Pad rows only up to a multiple of R (<= R-1 rows; usually zero).
    M_r = pl.cdiv(M, R) * R
    if M_r != M:
        # TODO(synk): rare corner case (M % R != 0) costs one small pad and a
        # trailing slice; typical shapes skip both entirely.
        patches = jnp.pad(patches, ((0, M_r - M), (0, 0)))
    Mf = M_r // R

    if R > 1:
        w_bd = jnp.kron(jnp.eye(R, dtype=w_flat.dtype), w_flat)   # (Kf, N)
        b_row = jnp.tile(bias, R).reshape(1, N).astype(jnp.float32)
    else:
        w_bd = w_flat
        b_row = bias.reshape(1, N).astype(jnp.float32)

    pf = patches.reshape(Mf, Kf)          # contiguity-preserving (free) fold

    # ---- row tiling (pipelined grid, ragged last block handled by Pallas) ---
    in_item = jnp.dtype(pf.dtype).itemsize
    out_dtype = x.dtype
    out_item = jnp.dtype(out_dtype).itemsize

    TMf = min(tile_rows, Mf)
    # With enough work, use >= 2 row tiles so the "parallel" axis can shard
    # across both v7x TensorCores (megacore).
    if Mf >= 2048:
        TMf = min(TMf, pl.cdiv(Mf, 2))
    # Cap tile so the double-buffered in+out working set stays <= ~40 MiB
    # (input minor dim is lane-padded to 128 in VMEM).
    bytes_per_row = max(Kf, 128) * in_item + max(N, 128) * out_item
    max_rows = (40 * 1024 * 1024) // (2 * bytes_per_row)
    TMf = min(TMf, max(8, max_rows))
    if TMf < Mf:
        TMf = max(8, (TMf // 8) * 8)      # sublane-aligned tiles; ragged last
                                          # grid block is masked (no pad/slice)

    grid = (pl.cdiv(Mf, TMf),)

    cost = pl.CostEstimate(
        flops=2 * M * K * E,
        transcendentals=0,
        bytes_accessed=M * K * in_item + K * E * in_item + M * E * out_item,
    )

    out_f = pl.pallas_call(
        _patch_embed_kernel,
        out_shape=jax.ShapeDtypeStruct((Mf, N), out_dtype),
        grid=grid,
        in_specs=[
            pl.BlockSpec((TMf, Kf), lambda i: (i, 0)),   # streamed, dbl-buffered
            pl.BlockSpec((Kf, N), lambda i: (0, 0)),     # VMEM-resident weight
            pl.BlockSpec((1, N), lambda i: (0, 0)),      # VMEM-resident bias
        ],
        out_specs=pl.BlockSpec((TMf, N), lambda i: (i, 0)),
        compiler_params=pltpu.CompilerParams(
            dimension_semantics=("parallel",),           # independent row tiles
            vmem_limit_bytes=48 * 1024 * 1024,           # v7x-safe (<64 MiB)
        ),
        cost_estimate=cost,
    )(pf, w_bd, b_row)

    # Free unfold: (Mf, R*E) -> (M_r, E)  (slice only in the rare padded case)
    out = out_f.reshape(M_r, E)
    if M_r != M:
        out = out[:M]
    return out.reshape(B, L_out, E)


if __name__ == "__main__":
    # Small shapes consistent with the module: traj_length=16, patch_size=2,
    # in_chans=4, embed_dim=32, batch=2.
    B, C, L = 2, 4, 16
    patch_size = 2
    E = 32

    key = jax.random.PRNGKey(0)
    kx, kw, kb = jax.random.split(key, 3)
    x = jax.random.normal(kx, (B, C, L), dtype=jnp.float32)
    weight = jax.random.normal(kw, (E, C, patch_size), dtype=jnp.float32) * 0.02
    bias = jax.random.normal(kb, (E,), dtype=jnp.float32) * 0.02

    out = patch_embed_1d(x, weight, bias, patch_size)
    out = jax.block_until_ready(out)

    # Pure-JAX reference (conv1d with stride=kernel_size == patchify+matmul).
    L_out = L // patch_size
    patches_ref = jnp.transpose(
        x.reshape(B, C, L_out, patch_size), (0, 2, 1, 3)
    ).reshape(B, L_out, C * patch_size)
    ref = patches_ref @ weight.reshape(E, C * patch_size).T + bias[None, None, :]

    assert out.shape == (B, L_out, E), out.shape
    assert jnp.allclose(out, ref, atol=1e-5, rtol=1e-5)

    # Also exercise the channels-last (free-patchify) input path.
    x_blc = jnp.transpose(x, (0, 2, 1))
    out_blc = jax.block_until_ready(
        patch_embed_1d(x_blc, weight, bias, patch_size, input_layout="BLC"))
    assert jnp.allclose(out_blc, ref, atol=1e-5, rtol=1e-5)

    print("KERNEL_OK")
</pallas_src>

<mosaic_0001>
module attributes {stable_mosaic.version = 11 : i64} {
  func.func @_patch_embed_kernel(%arg0: i32, %arg1: memref<4x32xf32, #tpu.memory_space<vmem>>, %arg2: memref<32x128xf32, #tpu.memory_space<vmem>>, %arg3: memref<1x128xf32, #tpu.memory_space<vmem>>, %arg4: memref<4x128xf32, #tpu.memory_space<vmem>>) attributes {dimension_semantics = [#tpu.dimension_semantics<parallel>], iteration_bounds = array<i64: 1>, scalar_prefetch = 0 : i64, scratch_operands = 0 : i64, tpu.core_type = #tpu.core_type<tc>, window_params = [{transform_indices = @transform_0, window_bounds = array<i64: 4, 32>}, {pipeline_mode = #tpu.pipeline_mode<synchronous>, transform_indices = @transform_1, window_bounds = array<i64: 32, 128>}, {pipeline_mode = #tpu.pipeline_mode<synchronous>, transform_indices = @transform_2, window_bounds = array<i64: 1, 128>}, {transform_indices = @transform_3, window_bounds = array<i64: 4, 128>}]} {
    %c0 = arith.constant 0 : index
    %c0_0 = arith.constant 0 : index
    %0 = vector.load %arg1[%c0, %c0_0] : memref<4x32xf32, #tpu.memory_space<vmem>>, vector<4x32xf32>
    %c0_1 = arith.constant 0 : index
    %c0_2 = arith.constant 0 : index
    %1 = vector.load %arg2[%c0_1, %c0_2] : memref<32x128xf32, #tpu.memory_space<vmem>>, vector<32x128xf32>
    %cst = arith.constant dense<0.000000e+00> : vector<4x128xf32>
    %2 = tpu.matmul %0, %1, %cst {dimension_numbers = #tpu.dot_dimension_numbers<[1], [0], [0], [1], [0, 0, 1, 1], [], []>} : vector<4x32xf32>, vector<32x128xf32>, vector<4x128xf32> -> vector<4x128xf32>
    %c0_3 = arith.constant 0 : index
    %c0_4 = arith.constant 0 : index
    %3 = vector.load %arg3[%c0_3, %c0_4] : memref<1x128xf32, #tpu.memory_space<vmem>>, vector<1x128xf32>
    %4 = vector.broadcast %3 : vector<1x128xf32> to vector<4x128xf32>
    %5 = arith.addf %2, %4 : vector<4x128xf32>
    %c0_5 = arith.constant 0 : index
    %c0_6 = arith.constant 0 : index
    %6 = vector.load %arg4[%c0_5, %c0_6] : memref<4x128xf32, #tpu.memory_space<vmem>>, vector<4x128xf32>
    tpu.vector_store %arg4[%c0_5, %c0_6], %5 {strides = array<i32>} : memref<4x128xf32, #tpu.memory_space<vmem>>, vector<4x128xf32>,
    return
  }
  func.func @transform_0(%arg0: i32) -> (i32, i32) {
    %c0_i32 = arith.constant 0 : i32
    %c0_i32_0 = arith.constant 0 : i32
    return %arg0, %c0_i32 : i32, i32
  }
  func.func @transform_1(%arg0: i32) -> (i32, i32) {
    %c0_i32 = arith.constant 0 : i32
    %c0_i32_0 = arith.constant 0 : i32
    %c0_i32_1 = arith.constant 0 : i32
    return %c0_i32, %c0_i32_0 : i32, i32
  }
  func.func @transform_2(%arg0: i32) -> (i32, i32) {
    %c0_i32 = arith.constant 0 : i32
    %c0_i32_0 = arith.constant 0 : i32
    %c0_i32_1 = arith.constant 0 : i32
    return %c0_i32, %c0_i32_0 : i32, i32
  }
  func.func @transform_3(%arg0: i32) -> (i32, i32) {
    %c0_i32 = arith.constant 0 : i32
    %c0_i32_0 = arith.constant 0 : i32
    return %arg0, %c0_i32 : i32, i32
  }
}

</mosaic_0001>

<bundles_post_ra>
// kernel: tpu_custom_call.1
= control target key start
LH: loop header
LB: loop body
LE: loop exit
PB: predicated region body
PF: predicated region fallthrough
CT: control target
= control target key end

     0   :  { %8 = vsyncpa [#allocation3], 0  ;;  %s322_s0 = inlined_call_operand.hbm [shape: f32[4,32], index: 0, kind: input, shape index: {}]   ;;  %s323_s1 = inlined_call_operand.hbm [shape: f32[32,128], index: 1, kind: input, shape index: {}]   ;;  %s324_s2 = inlined_call_operand.vmem [shape: f32[1,128], index: 2, kind: input, shape index: {}]   ;;  %s325_s3 = inlined_call_operand.hbm [shape: f32[4,128], index: 3, kind: output, shape index: {}]  }
   0x1   :  { %9 = vsyncpa [#allocation6], 0 }
   0x2   :  { %10 = vsyncpa [#allocation4], 0  ;;  %s248_s12 = smov [#allocation2]   ;;  %s249_s14 = smov [#allocation5]  }
   0x3   :  { %s17_s13 = sshll.u32 %s248_s12, 4  ;;  %s26_s15 = sshll.u32 %s249_s14, 4  ;;  %s18_s13 = int_to_ptr.vmem [resolvable:$true] %s17_s13  ;;  %s276_s15 = int_to_ptr.vmem [resolvable:$true] %s26_s15 }
   0x4   :  { %s176_s18 = scalar_lea.hbm %s322_s0, 64 }
   0x5   :  { %p177_p0 = scmp.ne.s32.totalorder %s322_s0, %s176_s18  ;;  %p180_p1 = scmp.lt.u32.totalorder %s176_s18, %s322_s0 }
   0x7   :  { %p182_p2 = pnand %p180_p1, %p177_p0 }
   0x9   :  { %185 = shalt.err (!%p182_p2)
}
   0xa   :  { %s186_s23 = scalar_lea.vmem %s18_s13, 64  ;;  %p191_p4 = scmp.lt.s32.totalorder %s18_s13, %s18_s13 }
   0xb   :  { %p187_p3 = scmp.ne.s32.totalorder %s18_s13, %s186_s23  ;;  %p192_p5 = scmp.lt.s32.totalorder %s186_s23, %s186_s23 }
   0xd   :  { %p193_p6 = por %p192_p5, %p191_p4 }
   0xf   :  { %p194_p7 = pnand %p193_p6, %p187_p3 }
  0x11   :  { %197 = shalt.err (!%p194_p7)
}
  0x12   :  { %20 = dma.hbm_to_vmem [thread:$0]  %s322_s0, 64, %s18_s13, [#allocation3]  }
  0x13   :  { %s198_s28 = scalar_lea.hbm %s323_s1, 512 }
  0x14   :  { %p199_p8 = scmp.ne.s32.totalorder %s323_s1, %s198_s28  ;;  %p202_p9 = scmp.lt.u32.totalorder %s198_s28, %s323_s1 }
  0x16   :  { %p204_p10 = pnand %p202_p9, %p199_p8 }
  0x18   :  { %207 = shalt.err (!%p204_p10)
}
  0x19   :  { %s208_s6 = scalar_lea.vmem %s276_s15, 512  ;;  %p213_p12 = scmp.lt.s32.totalorder %s276_s15, %s276_s15 }
  0x1a   :  { %p209_p11 = scmp.ne.s32.totalorder %s276_s15, %s208_s6  ;;  %p214_p13 = scmp.lt.s32.totalorder %s208_s6, %s208_s6 }
  0x1c   :  { %p215_p0 = por %p214_p13, %p213_p12 }
  0x1e   :  { %p216_p1 = pnand %p215_p0, %p209_p11 }
  0x20   :  { %219 = shalt.err (!%p216_p1)
}
  0x21   :  { %s250_s0 = smov 128   ;;  %s251_s7 = smov 8  }
  0x22   :  { %32 = dma.hbm_to_vmem [thread:$0]  %s323_s1, 512, %s276_s15, [#allocation6], %s250_s0, %s250_s0, %s251_s7  }
  0x23   :  { %242 = dma.done.wait [#allocation3], 64  }
  0x24   :  { %243 = vsyncadd [#allocation3], 4294967232 }
  0x25   :  { %244 = dma.done.wait [#allocation6], 512  }
  0x26   :  { %245 = vsyncadd [#allocation6], 4294966784  ;;  %v252_v0 = vmov 0.0|0.0   ;;  %vm253_vm0 = vmmov 0   ;;  %v254_v1 = vmov 0.0   ;;  %v42_v2 = vld [vmem:[#allocation5] sm:$0xff] }
  0x27   :  { %162 = vmatprep.subr.bf16.mxu0 %v252_v0  ;;  %159 = vmatprep.mubr.msk.f32.mxu0 %vm253_vm0, %v254_v1  ;;  %v43_v3 = vld [vmem:[#allocation5 + $0x8] sm:$0xff]  ;;  %v44_v4 = vld [vmem:[#allocation5 + $0x10] sm:$0xff]  ;;  %v45_v6 = vld [vmem:[#allocation5 + $0x18] sm:$0xff]  ;;  %vm53_vm1 = vcmask 261120   ;;  %s255_s11 = smov [#allocation7]  }
  0x28   :  { %v163_v5 = vpack.c.bf16 %v43_v3, %v42_v2  ;;  %v166_v7 = vpack.c.bf16 %v45_v6, %v44_v4  ;;  %v41_v8 = vld [vmem:[#allocation2] sm:$0xf]  ;;  %s134_s12 = sshll.u32 %s255_s11, 4  ;;  %s135_s12 = int_to_ptr.vmem [resolvable:$true] %s134_s12 }
  0x29   :  { %v144_v9 = vld [vmem:[%s324_s2] ss:$0 sm:$0xff]  ;;  %s220_s13 = scalar_lea.vmem %s135_s12, 64  ;;  %p225_p3 = scmp.lt.s32.totalorder %s135_s12, %s135_s12 }
  0x2a   :  { %164 = vmatpush3.bf16.msra.mxu0 %v163_v5  ;;  %p221_p2 = scmp.ne.s32.totalorder %s135_s12, %s220_s13  ;;  %p226_p4 = scmp.lt.s32.totalorder %s220_s13, %s220_s13 }
  0x2b   :  { %165 = vmatprep.subr.bf16.mxu0 %v252_v0 }
  0x2c   :  { %p227_p5 = por %p226_p4, %p225_p3 }
  0x2e   :  { %167 = vmatpush3.bf16.msra.mxu0 %v166_v7  ;;  %p228_p6 = pnand %p227_p5, %p221_p2 }
  0x31   :  { %160 = vmatmul.mubr.msk.f32.vlgmr.msra.gmra.mrb[0].mxu0 %vm53_vm1, %v41_v8 }
 0x104   :  { %v123_v10 = vpop.f32.mrb[0].mxu0 }
 0x105   :  { %v124_v11 = vadd.f32 %v144_v9, %v123_v10  ;;  %v161_v12 = vpop.f32.mrb[1].mxu0 }
 0x107   :  { %127 = vst [vmem:[#allocation7] sm:$0xf] %v124_v11 }
 0x108   :  { %231 = shalt.err (!%p228_p6)
}
 0x109   :  { %s232_s16 = scalar_lea.hbm %s325_s3, 64 }
 0x10a   :  { %p233_p7 = scmp.ne.s32.totalorder %s325_s3, %s232_s16  ;;  %p236_p8 = scmp.lt.u32.totalorder %s232_s16, %s325_s3 }
 0x10c   :  { %p238_p9 = pnand %p236_p8, %p233_p7 }
 0x10e   :  { %241 = shalt.err (!%p238_p9)
}
 0x10f   :  { %137 = dma.vmem_to_hbm [thread:$0]  %s135_s12, 64, %s325_s3, [#allocation4]  }
 0x110   :  { %246 = dma.done.wait [#allocation4], 64  }
 0x111   :  { %247 = vsyncadd [#allocation4], 4294967232 }
 0x112   :  { %141 = vsyncpa [#allocation3], 1 }
 0x113   :  { %142 = vsyncpa [#allocation6], 1 }
 0x114   :  { %143 = vsyncpa [#allocation4], 1 }

</bundles_post_ra>
